<compile_context>
chip_gen: v7x
topology: tpu7x:2x2x1
jax: 0.10.0
libtpu: 0.0.40
codegen_flags: <defaults>
</compile_context>

<pallas_src>
import functools
import math

import jax
import jax.numpy as jnp
from jax.experimental import pallas as pl
from jax.experimental.pallas import tpu as pltpu


def _patch_embed_kernel(eps, p_ref, w_ref, b_ref, g_ref, bb_ref, o_ref):
    """One (batch, token-tile) step: im2col'd projection + bias + LayerNorm.

    p_ref : (1, TN, Kdim)  im2col patches (compute dtype)
    w_ref : (Kdim, D)      projection weight (compute dtype)
    b_ref : (1, D)         conv bias        (f32)
    g_ref : (1, D)         LayerNorm gamma  (f32)
    bb_ref: (1, D)         LayerNorm beta   (f32)
    o_ref : (1, TN, D)     output, D lane-dense
    """
    y = jnp.dot(p_ref[0], w_ref[...],
                preferred_element_type=jnp.float32)          # MXU, f32 accum
    y = y + b_ref[...]                                       # conv bias

    # Fused single-pass LayerNorm over the embedding (lane) axis, f32.
    mu = jnp.mean(y, axis=-1, keepdims=True)
    ms = jnp.mean(y * y, axis=-1, keepdims=True)
    inv = jax.lax.rsqrt(ms - mu * mu + eps)
    o_ref[0] = ((y - mu) * inv * g_ref[...] + bb_ref[...]).astype(o_ref.dtype)


def _choose_token_tile(n, tn_max=512):
    """Pick the token-tile size TN.

    TN == n (full dim) is always legal; otherwise TN must be a multiple of 8.
    Prefer a divisor of n in [64, tn_max] so no padding/slicing is needed.
    """
    tn_max = max(8, (tn_max // 8) * 8)
    if n <= tn_max:
        return n
    for cand in range(tn_max, 63, -8):
        if n % cand == 0:
            return cand
    return tn_max                      # fall back: n gets padded up


def overlap_patch_embed_forward(x_nchw, w_oihw, b, gamma, beta, *,
                                stride=4, eps=1e-5,
                                compute_dtype=jnp.bfloat16,
                                out_dtype=jnp.float32,
                                token_tile=512):
    """x_nchw: (B, Cin, H, W). Returns ((B, Ho*Wo, D) out_dtype, Ho, Wo)."""
    B, Cin, H, W = x_nchw.shape
    D, _, Kh, Kw = w_oihw.shape
    ph, pw = Kh // 2, Kw // 2
    Hout = (H + 2 * ph - Kh) // stride + 1
    Wout = (W + 2 * pw - Kw) // stride + 1
    N = Hout * Wout
    Kdim = Kh * Kw * Cin

    # ---- wrapper-side layout plumbing (no compute) --------------------------
    # NCHW -> NHWC; cast to the compute dtype FIRST so both the im2col
    # materialization write and the kernel's patch read are half-width.
    x = jnp.transpose(x_nchw, (0, 2, 3, 1)).astype(compute_dtype)
    x = jnp.pad(x, ((0, 0), (ph, ph), (pw, pw), (0, 0)))     # conv padding
    # im2col: one strided slice per conv tap, channels-last. Element order
    # along the last axis is (ky, kx, cin), matching the weight flatten below.
    cols = []
    for ky in range(Kh):
        for kx in range(Kw):
            cols.append(x[:, ky:ky + stride * Hout:stride,
                          kx:kx + stride * Wout:stride, :])
    patches = jnp.concatenate(cols, axis=-1).reshape(B, N, Kdim)
    # Weight in matching (Kh, Kw, Cin, D) order, flattened to (Kdim, D).
    # No zero-pad of Kdim: block last dim == full array dim is legal and Mosaic
    # pads lanes in VMEM internally at zero HBM cost.
    w_mat = jnp.transpose(w_oihw, (2, 3, 1, 0)).reshape(Kdim, D)
    w_mat = w_mat.astype(compute_dtype)
    b2 = b.reshape(1, D).astype(jnp.float32)
    g2 = gamma.reshape(1, D).astype(jnp.float32)
    bb2 = beta.reshape(1, D).astype(jnp.float32)

    # ---- token tiling --------------------------------------------------------
    TN = _choose_token_tile(N, token_tile)
    Np = pl.cdiv(N, TN) * TN
    if Np != N:
        # Zero patch rows are harmless (they LayerNorm the bias vector) and
        # are sliced off below.
        patches = jnp.pad(patches, ((0, 0), (0, Np - N), (0, 0)))

    kernel = functools.partial(_patch_embed_kernel, eps)
    out = pl.pallas_call(
        kernel,
        out_shape=jax.ShapeDtypeStruct((B, Np, D), out_dtype),
        grid_spec=pltpu.PrefetchScalarGridSpec(
            num_scalar_prefetch=0,
            grid=(B, Np // TN),
            in_specs=[
                pl.BlockSpec((1, TN, Kdim), lambda bi, ni: (bi, ni, 0)),
                pl.BlockSpec((Kdim, D), lambda bi, ni: (0, 0)),
                pl.BlockSpec((1, D), lambda bi, ni: (0, 0)),
                pl.BlockSpec((1, D), lambda bi, ni: (0, 0)),
                pl.BlockSpec((1, D), lambda bi, ni: (0, 0)),
            ],
            out_specs=pl.BlockSpec((1, TN, D), lambda bi, ni: (bi, ni, 0)),
        ),
        compiler_params=pltpu.CompilerParams(
            dimension_semantics=("parallel", "parallel")),
    )(patches, w_mat, b2, g2, bb2)
    if Np != N:
        out = out[:, :N, :]
    return out, Hout, Wout


def reference_forward(x_nchw, w_oihw, b, gamma, beta, *, stride=4, eps=1e-5):
    """Pure-JAX reference: Conv2d(stride, pad=k//2) + flatten/transpose + LayerNorm."""
    Kh, Kw = w_oihw.shape[2], w_oihw.shape[3]
    y = jax.lax.conv_general_dilated(
        x_nchw, w_oihw, window_strides=(stride, stride),
        padding=((Kh // 2, Kh // 2), (Kw // 2, Kw // 2)),
        dimension_numbers=("NCHW", "OIHW", "NCHW"))
    y = y + b[None, :, None, None]
    B, D, Ho, Wo = y.shape
    y = y.reshape(B, D, Ho * Wo).transpose(0, 2, 1)          # (B, N, D)
    mu = y.mean(axis=-1, keepdims=True)
    var = ((y - mu) ** 2).mean(axis=-1, keepdims=True)
    y = (y - mu) / jnp.sqrt(var + eps)
    return y * gamma[None, None, :] + beta[None, None, :], Ho, Wo


if __name__ == "__main__":
    key = jax.random.PRNGKey(0)
    kx, kw, kb, kg, kbt = jax.random.split(key, 5)

    B, Cin, H, W = 2, 3, 16, 16
    D, K, stride = 128, 7, 4       # embed_dim=128 (lane-dense), patch_size=7

    x = jax.random.normal(kx, (B, Cin, H, W), jnp.float32)
    w = jax.random.normal(kw, (D, Cin, K, K), jnp.float32) * math.sqrt(2.0 / (K * K * D))
    b = 0.02 * jax.random.normal(kb, (D,), jnp.float32)
    gamma = 1.0 + 0.1 * jax.random.normal(kg, (D,), jnp.float32)
    beta = 0.1 * jax.random.normal(kbt, (D,), jnp.float32)

    ref, Hr, Wr = reference_forward(x, w, b, gamma, beta, stride=stride)

    # f32 compute path: tight check against the conv reference.
    out32, Ho, Wo = overlap_patch_embed_forward(
        x, w, b, gamma, beta, stride=stride, compute_dtype=jnp.float32)
    out32 = jax.block_until_ready(out32)
    assert out32.shape == (B, Hr * Wr, D) and (Ho, Wo) == (Hr, Wr)
    err32 = float(jnp.max(jnp.abs(out32 - ref)))
    assert err32 < 2e-3, err32

    # Default bf16 compute path (MXU-native on v5e/v6e/v7x); accumulation,
    # bias and the LayerNorm epilogue stay f32.
    out16, _, _ = overlap_patch_embed_forward(x, w, b, gamma, beta, stride=stride)
    out16 = jax.block_until_ready(out16)
    err16 = float(jnp.max(jnp.abs(out16 - ref)))
    assert err16 < 0.2, err16

    print("KERNEL_OK")
</pallas_src>

<mosaic_0001>
module attributes {stable_mosaic.version = 11 : i64} {
  func.func @_patch_embed_kernel(%arg0: i32, %arg1: i32, %arg2: memref<1x16x147xf32, #tpu.memory_space<vmem>>, %arg3: memref<147x128xf32, #tpu.memory_space<vmem>>, %arg4: memref<1x128xf32, #tpu.memory_space<vmem>>, %arg5: memref<1x128xf32, #tpu.memory_space<vmem>>, %arg6: memref<1x128xf32, #tpu.memory_space<vmem>>, %arg7: memref<1x16x128xf32, #tpu.memory_space<vmem>>) attributes {dimension_semantics = [#tpu.dimension_semantics<parallel>, #tpu.dimension_semantics<parallel>], iteration_bounds = array<i64: 2, 1>, scalar_prefetch = 0 : i64, scratch_operands = 0 : i64, tpu.core_type = #tpu.core_type<tc>, window_params = [{transform_indices = @transform_0, window_bounds = array<i64: 1, 16, 147>}, {pipeline_mode = #tpu.pipeline_mode<synchronous>, transform_indices = @transform_1, window_bounds = array<i64: 147, 128>}, {pipeline_mode = #tpu.pipeline_mode<synchronous>, transform_indices = @transform_2, window_bounds = array<i64: 1, 128>}, {pipeline_mode = #tpu.pipeline_mode<synchronous>, transform_indices = @transform_3, window_bounds = array<i64: 1, 128>}, {pipeline_mode = #tpu.pipeline_mode<synchronous>, transform_indices = @transform_4, window_bounds = array<i64: 1, 128>}, {transform_indices = @transform_5, window_bounds = array<i64: 1, 16, 128>}]} {
    %c0 = arith.constant 0 : index
    %c0_0 = arith.constant 0 : index
    %c0_1 = arith.constant 0 : index
    %0 = vector.load %arg2[%c0, %c0_0, %c0_1] : memref<1x16x147xf32, #tpu.memory_space<vmem>>, vector<1x16x147xf32>
    %1 = vector.shape_cast %0 : vector<1x16x147xf32> to vector<16x147xf32>
    %c0_2 = arith.constant 0 : index
    %c0_3 = arith.constant 0 : index
    %2 = vector.load %arg3[%c0_2, %c0_3] : memref<147x128xf32, #tpu.memory_space<vmem>>, vector<147x128xf32>
    %cst = arith.constant dense<0.000000e+00> : vector<16x128xf32>
    %3 = tpu.matmul %1, %2, %cst {dimension_numbers = #tpu.dot_dimension_numbers<[1], [0], [0], [1], [0, 0, 1, 1], [], []>} : vector<16x147xf32>, vector<147x128xf32>, vector<16x128xf32> -> vector<16x128xf32>
    %c0_4 = arith.constant 0 : index
    %c0_5 = arith.constant 0 : index
    %4 = vector.load %arg4[%c0_4, %c0_5] : memref<1x128xf32, #tpu.memory_space<vmem>>, vector<1x128xf32>
    %5 = vector.broadcast %4 : vector<1x128xf32> to vector<16x128xf32>
    %6 = arith.addf %3, %5 : vector<16x128xf32>
    %cst_6 = arith.constant dense<0.000000e+00> : vector<16xf32>
    %7 = vector.multi_reduction <add>, %6, %cst_6 [1] : vector<16x128xf32> to vector<16xf32>
    %8 = vector.shape_cast %7 : vector<16xf32> to vector<16x1xf32>
    %cst_7 = arith.constant 1.280000e+02 : f32
    %9 = vector.broadcast %cst_7 : f32 to vector<16x1xf32>
    %10 = arith.divf %8, %9 : vector<16x1xf32>
    %11 = arith.mulf %6, %6 : vector<16x128xf32>
    %cst_8 = arith.constant dense<0.000000e+00> : vector<16xf32>
    %12 = vector.multi_reduction <add>, %11, %cst_8 [1] : vector<16x128xf32> to vector<16xf32>
    %13 = vector.shape_cast %12 : vector<16xf32> to vector<16x1xf32>
    %cst_9 = arith.constant 1.280000e+02 : f32
    %14 = vector.broadcast %cst_9 : f32 to vector<16x1xf32>
    %15 = arith.divf %13, %14 : vector<16x1xf32>
    %16 = arith.mulf %10, %10 : vector<16x1xf32>
    %17 = arith.subf %15, %16 : vector<16x1xf32>
    %cst_10 = arith.constant 9.99999974E-6 : f32
    %18 = vector.broadcast %cst_10 : f32 to vector<16x1xf32>
    %19 = arith.addf %17, %18 : vector<16x1xf32>
    %20 = math.rsqrt %19 : vector<16x1xf32>
    %21 = vector.broadcast %10 : vector<16x1xf32> to vector<16x128xf32>
    %22 = arith.subf %6, %21 : vector<16x128xf32>
    %23 = vector.broadcast %20 : vector<16x1xf32> to vector<16x128xf32>
    %24 = arith.mulf %22, %23 : vector<16x128xf32>
    %c0_11 = arith.constant 0 : index
    %c0_12 = arith.constant 0 : index
    %25 = vector.load %arg5[%c0_11, %c0_12] : memref<1x128xf32, #tpu.memory_space<vmem>>, vector<1x128xf32>
    %26 = vector.broadcast %25 : vector<1x128xf32> to vector<16x128xf32>
    %27 = arith.mulf %24, %26 : vector<16x128xf32>
    %c0_13 = arith.constant 0 : index
    %c0_14 = arith.constant 0 : index
    %28 = vector.load %arg6[%c0_13, %c0_14] : memref<1x128xf32, #tpu.memory_space<vmem>>, vector<1x128xf32>
    %29 = vector.broadcast %28 : vector<1x128xf32> to vector<16x128xf32>
    %30 = arith.addf %27, %29 : vector<16x128xf32>
    %c0_15 = arith.constant 0 : index
    %c0_16 = arith.constant 0 : index
    %c0_17 = arith.constant 0 : index
    %31 = vector.load %arg7[%c0_15, %c0_16, %c0_17] : memref<1x16x128xf32, #tpu.memory_space<vmem>>, vector<1x16x128xf32>
    %32 = vector.shape_cast %31 : vector<1x16x128xf32> to vector<16x128xf32>
    %33 = vector.shape_cast %30 : vector<16x128xf32> to vector<1x16x128xf32>
    tpu.vector_store %arg7[%c0_15, %c0_16, %c0_17], %33 {strides = array<i32>} : memref<1x16x128xf32, #tpu.memory_space<vmem>>, vector<1x16x128xf32>,
    return
  }
  func.func @transform_0(%arg0: i32, %arg1: i32) -> (i32, i32, i32) {
    %c0_i32 = arith.constant 0 : i32
    %c0_i32_0 = arith.constant 0 : i32
    return %arg0, %arg1, %c0_i32 : i32, i32, i32
  }
  func.func @transform_1(%arg0: i32, %arg1: i32) -> (i32, i32) {
    %c0_i32 = arith.constant 0 : i32
    %c0_i32_0 = arith.constant 0 : i32
    %c0_i32_1 = arith.constant 0 : i32
    return %c0_i32, %c0_i32_0 : i32, i32
  }
  func.func @transform_2(%arg0: i32, %arg1: i32) -> (i32, i32) {
    %c0_i32 = arith.constant 0 : i32
    %c0_i32_0 = arith.constant 0 : i32
    %c0_i32_1 = arith.constant 0 : i32
    return %c0_i32, %c0_i32_0 : i32, i32
  }
  func.func @transform_3(%arg0: i32, %arg1: i32) -> (i32, i32) {
    %c0_i32 = arith.constant 0 : i32
    %c0_i32_0 = arith.constant 0 : i32
    %c0_i32_1 = arith.constant 0 : i32
    return %c0_i32, %c0_i32_0 : i32, i32
  }
  func.func @transform_4(%arg0: i32, %arg1: i32) -> (i32, i32) {
    %c0_i32 = arith.constant 0 : i32
    %c0_i32_0 = arith.constant 0 : i32
    %c0_i32_1 = arith.constant 0 : i32
    return %c0_i32, %c0_i32_0 : i32, i32
  }
  func.func @transform_5(%arg0: i32, %arg1: i32) -> (i32, i32, i32) {
    %c0_i32 = arith.constant 0 : i32
    %c0_i32_0 = arith.constant 0 : i32
    return %arg0, %arg1, %c0_i32 : i32, i32, i32
  }
}

</mosaic_0001>

<bundles_post_ra>
// kernel: tpu_custom_call.1
= control target key start
LH: loop header
LB: loop body
LE: loop exit
PB: predicated region body
PF: predicated region fallthrough
CT: control target
= control target key end

     0   :  { %10 = vsyncpa [#allocation3], 0  ;;  %s1152_s0 = inlined_call_operand.hbm [shape: f32[2,16,147], index: 0, kind: input, shape index: {}]   ;;  %s1153_s1 = inlined_call_operand.hbm [shape: f32[147,128], index: 1, kind: input, shape index: {}]   ;;  %s1154_s2 = inlined_call_operand.vmem [shape: f32[1,128], index: 2, kind: input, shape index: {}]   ;;  %s1155_s3 = inlined_call_operand.vmem [shape: f32[1,128], index: 3, kind: input, shape index: {}]   ;;  %s1156_s4 = inlined_call_operand.vmem [shape: f32[1,128], index: 4, kind: input, shape index: {}]   ;;  %s1157_s5 = inlined_call_operand.hbm [shape: f32[2,16,128], index: 5, kind: output, shape index: {}]  }
   0x1   :  { %12 = vsyncpa [#allocation3 + $0x1], 0 }
   0x2   :  { %13 = vsyncpa [#allocation6], 0 }
   0x3   :  { %14 = vsyncpa [#allocation4], 0 }
   0x4   :  { %16 = vsyncpa [#allocation4 + $0x1], 0  ;;  %s899_s18 = smov 0   ;;  %s901_s19 = smov 0  }
   0x5   :  { %s903_s20 = smov 0   ;;  %s905_s21 = smov 0  }
   0x6   :  { %s907_s22 = smov 0   ;;  %s909_s23 = smov 0  }
   0x7 LB: > { %s555_s24 = sadd.s32 4294967295, %s856_s23   ;;  %s556_s25 = sadd.s32 4294967294, %s856_s23   ;;  %s856_s23 = sphi %s909_s23, %s22_s23   ;;  %s852_s22 = sphi %s907_s22, %s1181_s22   ;;  %s848_s21 = sphi %s905_s21, %s1180_s21   ;;  %s844_s20 = sphi %s903_s20, %s1179_s20   ;;  %s840_s19 = sphi %s901_s19, %s1178_s19   ;;  %s836_s18 = sphi %s899_s18, %s1177_s18  }
   0x8   : > { %p56_p0 = scmp.ne.s32.totalorder %s840_s19, %s836_s18  ;;  %p933_p1 = scmp.eq.s32.totalorder %s555_s24, 0 }
   0x9   : > { %p937_p2 = scmp.eq.s32.totalorder %s555_s24, 1  ;;  %p172_p3 = scmp.eq.s32.totalorder %s556_s25, 1 }
   0xa   : > { %s1162_s26 = scalar_select %p933_p1, 1, 0 }
   0xb   : > { %s1163_s27 = scalar_select %p937_p2, 1, 0 }
   0xc   : > { %p943_p4 = por %p933_p1, %p56_p0  ;;  %p557_p5 = scmp.ge.s32.totalorder %s856_s23, 1 }
   0xd   : > { %p948_p6 = por %p172_p3, %p56_p0  ;;  %p179_p7 = scmp.lt.s32.totalorder %s856_s23, 3 }
   0xe   : > { %s1164_s28 = scalar_select %p943_p4, 1, 0 }
   0xf   : > { %s1165_s29 = scalar_select %p948_p6, 1, 0 }
  0x10   : > { %p953_p8 = pnand %p557_p5, %p179_p7  ;;  %s858_s6 = smov [#allocation5]  }
  0x11   : > { %s191_s7 = sshll.u32 %s858_s6, 4  ;;  %s34_s9 = sadd.s32 1, %s852_s22  ;;  %s192_s7 = int_to_ptr.vmem [resolvable:$true] %s191_s7 }
  0x12   : > { %s1166_s30 = scalar_select %p953_p8, 1, 0 }
  0x13   : > { %p635_p9 = pneg %p953_p8  ;;  %s712_s12 = scalar_lea.hbm %s1153_s1, 2432 }
  0x14   : > { %p713_p12 = scmp.ne.s32.totalorder %s1153_s1, %s712_s12  ;;  %p719_p5 = scmp.lt.u32.totalorder %s712_s12, %s1153_s1 }
  0x15   : > { %p962_p11 = pnand %p635_p9, %p933_p1 }
  0x17   : > { %p714_p13 = pneg %p962_p11 }
  0x19   : > { %p715_p0 = pnand %p714_p13, %p713_p12 }
  0x1b   : > { %p716_p3 = pneg %p715_p0 }
  0x1d   : > { %p721_p7 = pnand %p719_p5, %p716_p3 }
  0x1f   : > { %724 = shalt.err (!%p721_p7)
}
  0x20   : > { %s725_s17 = scalar_lea.vmem %s192_s7, 2432  ;;  %p733_p1 = scmp.lt.s32.totalorder %s192_s7, %s192_s7 }
  0x21   : > { %p726_p9 = scmp.ne.s32.totalorder %s192_s7, %s725_s17  ;;  %p734_p4 = scmp.lt.s32.totalorder %s725_s17, %s725_s17 }
  0x23   : > { %p728_p10 = pnand %p726_p9, %p714_p13  ;;  %p735_p8 = por %p734_p4, %p733_p1 }
  0x25   : > { %p729_p6 = pneg %p728_p10 }
  0x27   : > { %p736_p2 = pnand %p735_p8, %p729_p6 }
  0x29   : > { %739 = shalt.err (!%p736_p2)
}
  0x2a   : > { %s859_s24 = smov 128   ;;  %s860_s25 = smov 8  }
  0x2b   : > { %638 = dma.hbm_to_vmem [thread:$0]  (!%p962_p11), %s1153_s1, 2432, %s192_s7, [#allocation6], %s859_s24, %s859_s24, %s860_s25  }
  0x2c   : > { %p36_p1 = scmp.ge.s32.totalorder %s34_s9, 2  ;;  %s43_s11 = sadd.s32 1, %s844_s20 }
  0x2d   : > { %p50_p2 = scmp.ne.s32.totalorder %s844_s20, %s840_s19  ;;  %p51_p4 = scmp.eq.s32.totalorder %s856_s23, 0 }
  0x2e   : > { %s1183_s9 = smov (%p36_p1, %s34_s9), 0  ;;  %p1169_p8 = scmp.ne.s32.totalorder %s1163_s27, 0 }
  0x2f   : > { %p989_p6 = por %p51_p4, %p50_p2  ;;  %s38_s8 = ssub.s32 %s852_s22, %s1183_s9 }
  0x30   : > { %p995_p10 = por %p1169_p8, %p50_p2  ;;  %p648_p12 = scmp.lt.s32.totalorder %s856_s23, 2 }
  0x31   : > { %p41_p11 = scmp.eq.s32.totalorder %s38_s8, 0  ;;  %s214_s7 = sand.u32 1, %s844_s20  }
  0x32   : > { %s560_s14 = sshll.u32 %s214_s7, 5  ;;  %s578_s16 = sshll.u32 %s852_s22, 9 }
  0x33   : > { %s1004_s15 = scalar_select %p41_p11, %s844_s20, %s43_s11  }
  0x34   : > { %s1010_s25 = scalar_lea.hbm %s1152_s0, %s578_s16  ;;  %s218_s27 = scalar_lea.vmem [#allocation2], %s560_s14 }
  0x35   : > { %s228_s6 = sshll.u32 %s218_s27, 4  ;;  %p1016_p13 = pnand %p648_p12, %p989_p6  ;;  %s1012_s6 = int_to_ptr.vmem [resolvable:$true] %s228_s6 }
  0x36   : > { %s1020_s11 = scalar_lea.sflag [#allocation3], %s214_s7  ;;  %s740_s8 = scalar_lea.hbm %s1010_s25, 512 }
  0x37   : > { %p741_p0 = scmp.ne.s32.totalorder %s1010_s25, %s740_s8  ;;  %p742_p3 = pneg %p1016_p13 }
  0x38   : > { %s745_s12 = scalar_lea.hbm %s1152_s0, 1024  ;;  %p746_p9 = scmp.lt.u32.totalorder %s1010_s25, %s1152_s0 }
  0x39   : > { %p743_p5 = pnand %p742_p3, %p741_p0  ;;  %p747_p1 = scmp.lt.u32.totalorder %s745_s12, %s740_s8 }
  0x3a   : > { %p749_p4 = scmp.lt.u32.totalorder %s740_s8, %s1010_s25 }
  0x3b   : > { %p744_p7 = pneg %p743_p5  ;;  %p748_p2 = por %p747_p1, %p746_p9 }
  0x3d   : > { %p750_p6 = por %p749_p4, %p748_p2 }
  0x3f   : > { %p751_p8 = pnand %p750_p6, %p744_p7 }
  0x41   : > { %754 = shalt.err (!%p751_p8)
}
  0x42   : > { %s755_s7 = scalar_lea.vmem %s1012_s6, 512  ;;  %s861_s27 = smov [#allocation2]  }
  0x43   : > { %p756_p12 = scmp.ne.s32.totalorder %s1012_s6, %s755_s7  ;;  %s760_s14 = sshll.u32 %s861_s27, 4  ;;  %s761_s14 = int_to_ptr.vmem [resolvable:$false] %s760_s14 }
  0x44   : > { %s762_s16 = scalar_lea.vmem %s761_s14, 1024  ;;  %p763_p5 = scmp.lt.s32.totalorder %s1012_s6, %s761_s14 }
  0x45   : > { %p758_p11 = pnand %p756_p12, %p742_p3  ;;  %p764_p9 = scmp.lt.s32.totalorder %s762_s16, %s755_s7 }
  0x47   : > { %p759_p0 = pneg %p758_p11  ;;  %p765_p1 = por %p764_p9, %p763_p5 }
  0x49   : > { %p766_p2 = pnand %p765_p1, %p759_p0 }
  0x4b   : > { %769 = shalt.err (!%p766_p2)
}
  0x4c   : > { %s862_s8 = smov 256   ;;  %s863_s12 = smov 16  }
  0x4d   : > { %642 = dma.hbm_to_vmem [thread:$0]  (!%p1016_p13), %s1010_s25, 512, %s1012_s6, %s1020_s11, %s862_s8, %s862_s8, %s863_s12  }
  0x4e   : > { %p1172_p3 = scmp.ne.s32.totalorder %s1166_s30, 0 }
  0x4f   : > { %s1051_s17 = sand.u32 (!%p1172_p3), 1, %s840_s19   ;;  %p1173_p7 = scmp.ne.s32.totalorder (!%p1172_p3), %s1164_s28, 0 }
  0x50   : > { %240 = sbr.rel (%p1172_p3) target bundleno = 531 (0x213), region = 40  ;;  %s564_s24 = sshll.u32 (!%p1172_p3), %s1051_s17, 5 }
  0x51   : > { %s243_s7 = scalar_lea.sflag (!%p1172_p3), [#allocation3], %s1051_s17  ;;  %s1055_s27 = scalar_lea.vmem (!%p1172_p3), [#allocation2], %s564_s24 }
  0x57   : > { %823 = dma.done.wait (%p1173_p7), %s243_s7, 512  }
  0x58   : > { %825 = vsyncadd (%p1173_p7), %s243_s7, 4294966784  ;;  %p1174_p13 = scmp.ne.s32.totalorder %s1162_s26, 0 }
  0x5a   : > { %827 = dma.done.wait (%p1174_p13), [#allocation6], 2432  }
  0x5b   : > { %829 = vsyncadd (%p1174_p13), [#allocation6], 4294964864  ;;  %v864_v0 = vmov 0.0|0.0   ;;  %v283_v1 = vld [vmem:[#allocation5] sm:$0xff]  ;;  %v284_v2 = vld [vmem:[#allocation5 + $0x8] sm:$0xff]  ;;  %vm309_vm0 = vcmask 154624  }
  0x5c   : > { %580 = vmatprep.subr.bf16.mxu0 %v864_v0  ;;  %607 = vmatprep.subr.bf16.mxu1 %v864_v0  ;;  %v285_v3 = vld [vmem:[#allocation5 + $0x10] sm:$0xff]  ;;  %v581_v4 = vpack.c.bf16 %v284_v2, %v283_v1  ;;  %v286_v5 = vld [vmem:[#allocation5 + $0x18] sm:$0xff]  ;;  %v287_v7 = vld [vmem:[#allocation5 + $0x20] sm:$0xff]  ;;  %v865_v30 = vmov 0.0   ;;  %vm316_vm1 = vcmask 1042432   ;;  %s566_s6 = sshll.u32 %s1051_s17, 4 }
  0x5d   : > { %v584_v6 = vpack.c.bf16 %v286_v5, %v285_v3  ;;  %v288_v8 = vld [vmem:[#allocation5 + $0x28] sm:$0xff]  ;;  %v282_v11 = vld [vmem:[%s1055_s27 + $0x18] sm:$0xff]  ;;  %v289_v12 = vld [vmem:[#allocation5 + $0x30] sm:$0xff]  ;;  %s579_s14 = sshll.u32 %s848_s21, 8  ;;  %s276_s16 = scalar_lea.vmem [#allocation7], %s566_s6 }
  0x5e   : > { %582 = vmatpush1.bf16.msra.mxu0 %v581_v4  ;;  %617 = vmatpush1.bf16.msra.mxu1 %v581_v4  ;;  %v280_v9 = vld [vmem:[%s1055_s27 + $0x8] sm:$0xff]  ;;  %v587_v10 = vpack.c.bf16 %v288_v8, %v287_v7  ;;  %v290_v13 = vld [vmem:[#allocation5 + $0x38] sm:$0xff]  ;;  %v291_v15 = vld [vmem:[#allocation5 + $0x40] sm:$0xff]  ;;  %s458_s8 = sshll.u32 %s276_s16, 4  ;;  %s1101_s7 = scalar_lea.hbm %s1157_s5, %s579_s14  ;;  %s1103_s8 = int_to_ptr.vmem [resolvable:$true] %s458_s8 }
  0x5f   : > { %583 = vmatprep.subr.bf16.mxu0 %v864_v0  ;;  %608 = vmatprep.subr.bf16.mxu1 %v864_v0  ;;  %v590_v14 = vpack.c.bf16 %v290_v13, %v289_v12  ;;  %v292_v16 = vld [vmem:[#allocation5 + $0x48] sm:$0xff]  ;;  %v293_v18 = vld [vmem:[#allocation5 + $0x50] sm:$0xff]  ;;  %v294_v19 = vld [vmem:[#allocation5 + $0x58] sm:$0xff]  ;;  %s770_s26 = scalar_lea.vmem %s1103_s8, 256  ;;  %s866_s21 = smov [#allocation7]  }
  0x60   : > { %569 = vmatprep.mubr.msk.f32.mxu0 %vm309_vm0, %v280_v9  ;;  %570 = vmatprep.mubr.msk.f32.mxu1 %vm309_vm0, %v282_v11  ;;  %v593_v17 = vpack.c.bf16 %v292_v16, %v291_v15  ;;  %v596_v20 = vpack.c.bf16 %v294_v19, %v293_v18  ;;  %v295_v21 = vld [vmem:[#allocation5 + $0x60] sm:$0xff]  ;;  %v296_v22 = vld [vmem:[#allocation5 + $0x68] sm:$0xff]  ;;  %v297_v24 = vld [vmem:[#allocation5 + $0x70] sm:$0xff]  ;;  %p771_p4 = scmp.ne.s32.totalorder %s1103_s8, %s770_s26  ;;  %s774_s28 = sshll.u32 %s866_s21, 4  ;;  %s775_s28 = int_to_ptr.vmem [resolvable:$false] %s774_s28 }
  0x61   : > { %v599_v23 = vpack.c.bf16 %v296_v22, %v295_v21  ;;  %v298_v25 = vld [vmem:[#allocation5 + $0x78] sm:$0xff]  ;;  %v299_v27 = vld [vmem:[#allocation5 + $0x80] sm:$0xff]  ;;  %v300_v28 = vld [vmem:[#allocation5 + $0x88] sm:$0xff]  ;;  %s776_s30 = scalar_lea.vmem %s775_s28, 512  ;;  %p777_p12 = scmp.lt.s32.totalorder %s1103_s8, %s775_s28 }
  0x62   : > { %585 = vmatpush1.bf16.msra.mxu0 %v584_v6  ;;  %618 = vmatpush1.bf16.msra.mxu1 %v584_v6  ;;  %v602_v26 = vpack.c.bf16 %v298_v25, %v297_v24  ;;  %v605_v29 = vpack.c.bf16 %v300_v28, %v299_v27  ;;  %v301_v31 = vld [vmem:[#allocation5 + $0x90] sm:$0x7]  ;;  %v279_v32 = vld [vmem:[%s1055_s27] sm:$0xff]  ;;  %p772_p6 = pnand %p771_p4, %p995_p10  ;;  %p778_p11 = scmp.lt.s32.totalorder %s776_s30, %s770_s26 }
  0x63   : > { %586 = vmatprep.subr.bf16.mxu0 %v864_v0  ;;  %609 = vmatprep.subr.bf16.mxu1 %v864_v0  ;;  %v281_v33 = vld [vmem:[%s1055_s27 + $0x10] sm:$0xff]  ;;  %v567_v34 = vld [vmem:[%s1154_s2] ss:$0 sm:$0xff]  ;;  %s443_s27 = scalar_lea.sflag [#allocation4], %s1051_s17 }
  0x64   : > { %v571_v59 = vld [vmem:[%s1155_s3] ss:$0 sm:$0xff]  ;;  %p773_p8 = pneg %p772_p6  ;;  %p779_p0 = por %p778_p11, %p777_p12 }
  0x65   : > { %v572_v61 = vld [vmem:[%s1156_s4] ss:$0 sm:$0xff] }
  0x66   : > { %588 = vmatpush1.bf16.msra.mxu0 %v587_v10  ;;  %619 = vmatpush1.bf16.msra.mxu1 %v587_v10  ;;  %p780_p5 = pnand %p779_p0, %p773_p8 }
  0x67   : > { %589 = vmatprep.subr.bf16.mxu0 %v864_v0  ;;  %610 = vmatprep.subr.bf16.mxu1 %v864_v0 }
  0x6a   : > { %591 = vmatpush1.bf16.msra.mxu0 %v590_v14  ;;  %620 = vmatpush1.bf16.msra.mxu1 %v590_v14 }
  0x6b   : > { %592 = vmatprep.subr.bf16.mxu0 %v864_v0  ;;  %611 = vmatprep.subr.bf16.mxu1 %v864_v0 }
  0x6e   : > { %594 = vmatpush1.bf16.msra.mxu0 %v593_v17  ;;  %621 = vmatpush1.bf16.msra.mxu1 %v593_v17 }
  0x6f   : > { %595 = vmatprep.subr.bf16.mxu0 %v864_v0  ;;  %612 = vmatprep.subr.bf16.mxu1 %v864_v0 }
  0x72   : > { %597 = vmatpush1.bf16.msra.mxu0 %v596_v20  ;;  %622 = vmatpush1.bf16.msra.mxu1 %v596_v20 }
  0x73   : > { %598 = vmatprep.subr.bf16.mxu0 %v864_v0  ;;  %613 = vmatprep.subr.bf16.mxu1 %v864_v0 }
  0x76   : > { %600 = vmatpush1.bf16.msra.mxu0 %v599_v23  ;;  %623 = vmatpush1.bf16.msra.mxu1 %v599_v23 }
  0x77   : > { %601 = vmatprep.subr.bf16.mxu0 %v864_v0  ;;  %614 = vmatprep.subr.bf16.mxu1 %v864_v0 }
  0x7a   : > { %603 = vmatpush1.bf16.msra.mxu0 %v602_v26  ;;  %624 = vmatpush1.bf16.msra.mxu1 %v602_v26 }
  0x7b   : > { %604 = vmatprep.subr.bf16.mxu0 %v864_v0  ;;  %615 = vmatprep.subr.bf16.mxu1 %v864_v0 }
  0x7e   : > { %606 = vmatpush1.bf16.msra.mxu0 %v605_v29  ;;  %625 = vmatpush1.bf16.msra.mxu1 %v605_v29 }
  0x7f   : > { %356 = vmatprep.subr.mxu0 %v865_v30  ;;  %616 = vmatprep.subr.mxu1 %v865_v30 }
  0x82   : > { %568 = vmatpush1.msk.msra.mxu0 %vm316_vm1, %v301_v31  ;;  %626 = vmatpush1.msk.msra.mxu1 %vm316_vm1, %v301_v31 }
  0x83   : > { %385 = vmatmul.mubr.f32.vlgmr.msra.gmra.mrb[0].mxu0 %v279_v32  ;;  %390 = vmatmul.mubr.f32.vlgmr.msra.gmra.mrb[0].mxu1 %v281_v33 }
 0x156   : > { %v386_v35 = vpop.f32.mrb[0].mxu0  ;;  %v391_v36 = vpop.f32.mrb[0].mxu1 }
 0x157   : > { %v387_v37 = vadd.f32 %v567_v34, %v386_v35  ;;  %v388_v38 = vpop.f32.mrb[1].mxu0  ;;  %v392_v39 = vadd.f32 %v567_v34, %v391_v36  ;;  %v393_v40 = vpop.f32.mrb[1].mxu1 }
 0x159   : > { %395 = vadd.xlane.f32.xlu0 %v387_v37  ;;  %v402_v41 = vmul.f32 %v387_v37, %v387_v37  ;;  %v403_v42 = vmul.f32 %v392_v39, %v392_v39 }
 0x15b   : > { %404 = vadd.xlane.f32.xlu1 %v402_v41 }
 0x15d   : > { %397 = vadd.xlane.f32.xlu0 %v392_v39 }
 0x15f   : > { %406 = vadd.xlane.f32.xlu1 %v403_v42 }
 0x1e6   : > { %v396_v43 = vpop.xlane.xlu0 %395 }
 0x1e7   : > { %v400_v44 = vmul.f32 0.0078125, %v396_v43 }
 0x1e8   : > { %v405_v45 = vpop.xlane.xlu1 %404 }
 0x1e9   : > { %v410_v46 = vmul.f32 %v400_v44, %v400_v44  ;;  %v408_v47 = vmul.f32 0.0078125, %v405_v45  ;;  %v418_v57 = vsub.f32 %v387_v37, %v400_v44 }
 0x1ea   : > { %v398_v48 = vpop.xlane.xlu0 %397 }
 0x1eb   : > { %v412_v49 = vsub.f32 %v408_v47, %v410_v46  ;;  %v401_v50 = vmul.f32 0.0078125, %v398_v48 }
 0x1ec   : > { %v407_v51 = vpop.xlane.xlu1 %406 }
 0x1ed   : > { %v414_v52 = vadd.f32 1e-05, %v412_v49  ;;  %v411_v53 = vmul.f32 %v401_v50, %v401_v50  ;;  %v409_v54 = vmul.f32 0.0078125, %v407_v51  ;;  %v419_v63 = vsub.f32 %v392_v39, %v401_v50 }
 0x1ef   : > { %708 = vrsqrt.f32 %v414_v52  ;;  %v413_v55 = vsub.f32 %v409_v54, %v411_v53 }
 0x1f1   : > { %v415_v56 = vadd.f32 1e-05, %v413_v55 }
 0x1f3   : > { %710 = vrsqrt.f32 %v415_v56 }
 0x1f9   : > { %v709_v58 = vpop.eup %708 }
 0x1fa   : > { %v420_v60 = vmul.f32 %v709_v58, %v418_v57 }
 0x1fc   : > { %v429_v62 = vmul.f32 %v571_v59, %v420_v60 }
 0x1fd   : > { %v711_v0 = vpop.eup %710 }
 0x1fe   : > { %v438_v1 = vadd.f32 %v572_v61, %v429_v62  ;;  %v421_v2 = vmul.f32 %v711_v0, %v419_v63 }
 0x200   : > { %v430_v3 = vmul.f32 %v571_v59, %v421_v2  ;;  %440 = vst [vmem:[%s276_s16] sm:$0xff] %v438_v1 }
 0x202   : > { %v439_v4 = vadd.f32 %v572_v61, %v430_v3 }
 0x204   : > { %441 = vst [vmem:[%s276_s16 + $0x8] sm:$0xff] %v439_v4 }
 0x205   : > { %783 = shalt.err (!%p780_p5)
}
 0x206   : > { %s784_s25 = scalar_lea.hbm %s1101_s7, 256  ;;  %s788_s11 = scalar_lea.hbm %s1157_s5, 512 }
 0x207   : > { %p785_p9 = scmp.ne.s32.totalorder %s1101_s7, %s784_s25  ;;  %p789_p3 = scmp.lt.u32.totalorder %s1101_s7, %s1157_s5 }
 0x208   : > { %p790_p7 = scmp.lt.u32.totalorder %s788_s11, %s784_s25  ;;  %p792_p4 = scmp.lt.u32.totalorder %s784_s25, %s1101_s7 }
 0x209   : > { %p786_p1 = pnand %p785_p9, %p995_p10 }
 0x20a   : > { %p791_p13 = por %p790_p7, %p789_p3 }
 0x20b   : > { %p787_p2 = pneg %p786_p1 }
 0x20c   : > { %p793_p6 = por %p792_p4, %p791_p13 }
 0x20e   : > { %p794_p8 = pnand %p793_p6, %p787_p2 }
 0x210   : > { %797 = shalt.err (!%p794_p8)
}
 0x211   : > { %s867_s12 = smov 128   ;;  %s868_s24 = smov 8  }
 0x212   : > { %633 = dma.vmem_to_hbm [thread:$0]  (%p995_p10), %s1103_s8, 256, %s1101_s7, %s443_s27, %s867_s12, %s867_s12, %s868_s24  }
 0x213 PF: > { %s473_s26 = sand.u32 1, %s836_s18   ;;  %p1175_p12 = scmp.ne.s32.totalorder %s1165_s29, 0 }
 0x214   : > { %p1176_p11 = scmp.ge.s32.totalorder %s856_s23, 2  ;;  %s474_s21 = scalar_lea.sflag [#allocation4], %s473_s26 }
 0x216   : > { %p644_p0 = pnand %p1176_p11, %p1175_p12 }
 0x218   : > { %831 = dma.done.wait (!%p644_p0), %s474_s21, 256  }
 0x219   : > { %833 = vsyncadd (!%p644_p0), %s474_s21, 4294967040  ;;  %s22_s23 = sadd.s32 1, %s856_s23   ;;  %s1177_s18 = smov %s840_s19 }
 0x21a   : > { %p19_p5 = scmp.ge.s32.totalorder %s22_s23, 4   ;;  %s1178_s19 = smov %s844_s20 }
 0x21b   : > { %s1179_s20 = smov %s1004_s15  ;;  %s1180_s21 = smov %s852_s22 }
 0x21c   : > { %s1181_s22 = smov %s1183_s9  ;;  %21 = sbr.rel (!%p19_p5) target bundleno = 7 (0x7), region = 89 }
 0x223   :  { %479 = vsyncpa [#allocation3], 1 }
 0x224   :  { %481 = vsyncpa [#allocation3 + $0x1], 1 }
 0x225   :  { %482 = vsyncpa [#allocation6], 1 }
 0x226   :  { %483 = vsyncpa [#allocation4], 1 }
 0x227   :  { %485 = vsyncpa [#allocation4 + $0x1], 1 }

</bundles_post_ra>
